<compile_context>
chip_gen: v6e
topology: v6e:2x2x1
jax: 0.10.0
libtpu: 0.0.40
codegen_flags: <defaults>
</compile_context>

<pallas_src>
import jax
import jax.numpy as jnp
from jax.experimental import pallas as pl
from jax.experimental.pallas import tpu as pltpu


def _round_up(n, m):
    return ((n + m - 1) // m) * m


def _mlp_embed_tile(x_f32, w1_bf16, b1_f32, w2_bf16, b2_f32):
    """out = relu(x @ W1 + b1) @ W2 + b2  (bf16 MXU inputs, f32 accumulate)."""
    x = x_f32.astype(jnp.bfloat16)                       # in-kernel cast (VPU)
    h = jnp.dot(x, w1_bf16,
                preferred_element_type=jnp.float32)      # (TM, H) f32 acc, MXU
    h = jnp.maximum(h + b1_f32, 0.0)                     # bias + ReLU, f32 VPU
    e = jnp.dot(h.astype(jnp.bfloat16), w2_bf16,
                preferred_element_type=jnp.float32)      # (TM, E) f32 acc, MXU
    return e + b2_f32


def _single_kernel(x_ref, w1_ref, b1_ref, w2_ref, b2_ref, out_ref):
    out_ref[...] = _mlp_embed_tile(x_ref[...], w1_ref[...], b1_ref[...],
                                   w2_ref[...], b2_ref[...])


def _triplet_kernel(x1_ref, x2_ref, x3_ref,
                    w1_ref, b1_ref, w2_ref, b2_ref,
                    o1_ref, o2_ref, o3_ref):
    # Shared weights loaded once per grid step (resident blocks).
    w1 = w1_ref[...]
    b1 = b1_ref[...]
    w2 = w2_ref[...]
    b2 = b2_ref[...]
    o1_ref[...] = _mlp_embed_tile(x1_ref[...], w1, b1, w2, b2)
    o2_ref[...] = _mlp_embed_tile(x2_ref[...], w1, b1, w2, b2)
    o3_ref[...] = _mlp_embed_tile(x3_ref[...], w1, b1, w2, b2)


def _run_embedding(xs, w1_bf16, b1_f32, w2_bf16, b2_f32, *, row_tile=256):
    """Run the fused 2-layer MLP on 1 or 3 (N, D) f32 batches -> (N, E) f32 each."""
    n_inputs = len(xs)
    N, D = xs[0].shape
    H = w1_bf16.shape[1]
    E = w2_bf16.shape[1]

    if N <= row_tile:
        # Block == full array extent on the row axis: no (8,128) constraint,
        # no padding / slicing passes needed.
        tm, n_pad = N, N
    else:
        tm = row_tile
        n_pad = _round_up(N, tm)

    if n_pad != N:
        xs = tuple(jnp.pad(x, ((0, n_pad - N), (0, 0))) for x in xs)

    grid = (n_pad // tm,)

    x_spec = pl.BlockSpec((tm, D), lambda i: (i, 0))       # row tile, pipelined
    w_specs = [
        pl.BlockSpec((D, H), lambda i: (0, 0)),             # W1 resident
        pl.BlockSpec((1, H), lambda i: (0, 0)),              # b1 resident
        pl.BlockSpec((H, E), lambda i: (0, 0)),             # W2 resident
        pl.BlockSpec((1, E), lambda i: (0, 0)),              # b2 resident
    ]
    out_spec = pl.BlockSpec((tm, E), lambda i: (i, 0))

    flops = 2 * n_inputs * n_pad * (D * H + H * E)
    bytes_accessed = (n_inputs * n_pad * D * 4               # f32 activations in
                      + D * H * 2 + H * E * 2                # bf16 weights (once)
                      + (H + E) * 4                          # f32 biases
                      + n_inputs * n_pad * E * 4)            # f32 outputs

    kernel = _single_kernel if n_inputs == 1 else _triplet_kernel
    out_shape = tuple(jax.ShapeDtypeStruct((n_pad, E), jnp.float32)
                      for _ in range(n_inputs))

    outs = pl.pallas_call(
        kernel,
        out_shape=out_shape,
        grid_spec=pltpu.PrefetchScalarGridSpec(
            num_scalar_prefetch=0,
            grid=grid,
            in_specs=[x_spec] * n_inputs + w_specs,
            out_specs=[out_spec] * n_inputs,
        ),
        compiler_params=pltpu.CompilerParams(
            dimension_semantics=("parallel",)),               # v7x: 2 TCs split rows
        cost_estimate=pl.CostEstimate(
            flops=flops, transcendentals=0, bytes_accessed=bytes_accessed),
    )(*xs, w1_bf16, b1_f32, w2_bf16, b2_f32)

    if n_pad != N:
        outs = tuple(o[:N] for o in outs)
    return outs


class EmbeddingNet:
    """Simple MLP embedding net with shared, deterministic parameters."""

    def __init__(self, in_dim, hidden_dim, emb_dim, key):
        k1, k2 = jax.random.split(key)
        scale1 = 1.0 / jnp.sqrt(jnp.float32(in_dim))
        scale2 = 1.0 / jnp.sqrt(jnp.float32(hidden_dim))
        self.w1 = jax.random.normal(k1, (in_dim, hidden_dim),
                                    dtype=jnp.float32) * scale1
        self.b1 = jnp.zeros((1, hidden_dim), dtype=jnp.float32)
        self.w2 = jax.random.normal(k2, (hidden_dim, emb_dim),
                                    dtype=jnp.float32) * scale2
        self.b2 = jnp.zeros((1, emb_dim), dtype=jnp.float32)
        # Pre-cast bf16 weight copies for the MXU path (done once, not per call).
        self.w1_bf16 = self.w1.astype(jnp.bfloat16)
        self.w2_bf16 = self.w2.astype(jnp.bfloat16)

    @staticmethod
    def _flatten(x):
        # (B, C, H, W) NCHW -> (B, C*H*W); stays f32, cast happens in-kernel.
        return x.reshape(x.shape[0], -1)

    def _embed(self, *xs_flat):
        return _run_embedding(xs_flat, self.w1_bf16, self.b1,
                              self.w2_bf16, self.b2)

    def get_embedding(self, x):
        return self._embed(self._flatten(x))[0]


class TripletNet:
    """JAX/Pallas port of the PyTorch TripletNet wrapper."""

    def __init__(self, embedding_net):
        self.enet = embedding_net

    def forward(self, x1, x2=None, x3=None):
        if x2 is None and x3 is None:
            return self.enet.get_embedding(x1)
        # All three shared-weight embeddings in ONE kernel launch,
        # no activation concat / slice passes.
        e1, e2, e3 = self.enet._embed(self.enet._flatten(x1),
                                      self.enet._flatten(x2),
                                      self.enet._flatten(x3))
        return e1, e2, e3

    def __call__(self, x1, x2=None, x3=None):
        return self.forward(x1, x2, x3)

    def get_embedding(self, x):
        return self.enet.get_embedding(x)


if __name__ == "__main__":
    B, C, H, W = 2, 4, 16, 16          # small NCHW inputs
    HIDDEN, EMB = 128, 128             # lane-dense (multiple of 128)
    D = C * H * W                      # 1024

    key = jax.random.PRNGKey(0)
    k_params, k1, k2, k3 = jax.random.split(key, 4)

    enet = EmbeddingNet(D, HIDDEN, EMB, k_params)
    net = TripletNet(enet)

    x1 = jax.random.normal(k1, (B, C, H, W), dtype=jnp.float32)
    x2 = jax.random.normal(k2, (B, C, H, W), dtype=jnp.float32)
    x3 = jax.random.normal(k3, (B, C, H, W), dtype=jnp.float32)

    # Triplet path: three shared-weight embeddings, ONE pallas_call.
    e1, e2, e3 = net(x1, x2, x3)
    jax.block_until_ready((e1, e2, e3))

    # Single-input path.
    e_single = net(x1)
    jax.block_until_ready(e_single)

    # Reference: plain-JAX forward with the same bf16 casts and f32 accumulation.
    def ref_embed(x):
        xf = x.reshape(x.shape[0], -1).astype(jnp.bfloat16)
        h = jnp.dot(xf, enet.w1_bf16, preferred_element_type=jnp.float32)
        h = jnp.maximum(h + enet.b1, 0.0)
        e = jnp.dot(h.astype(jnp.bfloat16), enet.w2_bf16,
                    preferred_element_type=jnp.float32)
        return e + enet.b2

    assert e1.shape == (B, EMB) and e2.shape == (B, EMB) and e3.shape == (B, EMB)
    assert e1.dtype == jnp.float32
    assert jnp.allclose(e1, ref_embed(x1), atol=1e-3, rtol=1e-3)
    assert jnp.allclose(e2, ref_embed(x2), atol=1e-3, rtol=1e-3)
    assert jnp.allclose(e3, ref_embed(x3), atol=1e-3, rtol=1e-3)
    assert jnp.allclose(e_single, e1, atol=1e-5)

    print("KERNEL_OK")
</pallas_src>

<mosaic_0001>
module attributes {stable_mosaic.version = 11 : i64} {
  func.func @_triplet_kernel(%arg0: i32, %arg1: memref<2x1024xf32, #tpu.memory_space<vmem>>, %arg2: memref<2x1024xf32, #tpu.memory_space<vmem>>, %arg3: memref<2x1024xf32, #tpu.memory_space<vmem>>, %arg4: memref<1024x128xbf16, #tpu.memory_space<vmem>>, %arg5: memref<1x128xf32, #tpu.memory_space<vmem>>, %arg6: memref<128x128xbf16, #tpu.memory_space<vmem>>, %arg7: memref<1x128xf32, #tpu.memory_space<vmem>>, %arg8: memref<2x128xf32, #tpu.memory_space<vmem>>, %arg9: memref<2x128xf32, #tpu.memory_space<vmem>>, %arg10: memref<2x128xf32, #tpu.memory_space<vmem>>) attributes {dimension_semantics = [#tpu.dimension_semantics<parallel>], iteration_bounds = array<i64: 1>, scalar_prefetch = 0 : i64, scratch_operands = 0 : i64, tpu.core_type = #tpu.core_type<tc>, window_params = [{transform_indices = @transform_0, window_bounds = array<i64: 2, 1024>}, {transform_indices = @transform_1, window_bounds = array<i64: 2, 1024>}, {transform_indices = @transform_2, window_bounds = array<i64: 2, 1024>}, {pipeline_mode = #tpu.pipeline_mode<synchronous>, transform_indices = @transform_3, window_bounds = array<i64: 1024, 128>}, {pipeline_mode = #tpu.pipeline_mode<synchronous>, transform_indices = @transform_4, window_bounds = array<i64: 1, 128>}, {pipeline_mode = #tpu.pipeline_mode<synchronous>, transform_indices = @transform_5, window_bounds = array<i64: 128, 128>}, {pipeline_mode = #tpu.pipeline_mode<synchronous>, transform_indices = @transform_6, window_bounds = array<i64: 1, 128>}, {transform_indices = @transform_7, window_bounds = array<i64: 2, 128>}, {transform_indices = @transform_8, window_bounds = array<i64: 2, 128>}, {transform_indices = @transform_9, window_bounds = array<i64: 2, 128>}]} {
    %c0 = arith.constant 0 : index
    %c0_0 = arith.constant 0 : index
    %0 = vector.load %arg4[%c0, %c0_0] : memref<1024x128xbf16, #tpu.memory_space<vmem>>, vector<1024x128xbf16>
    %c0_1 = arith.constant 0 : index
    %c0_2 = arith.constant 0 : index
    %1 = vector.load %arg5[%c0_1, %c0_2] : memref<1x128xf32, #tpu.memory_space<vmem>>, vector<1x128xf32>
    %c0_3 = arith.constant 0 : index
    %c0_4 = arith.constant 0 : index
    %2 = vector.load %arg6[%c0_3, %c0_4] : memref<128x128xbf16, #tpu.memory_space<vmem>>, vector<128x128xbf16>
    %c0_5 = arith.constant 0 : index
    %c0_6 = arith.constant 0 : index
    %3 = vector.load %arg7[%c0_5, %c0_6] : memref<1x128xf32, #tpu.memory_space<vmem>>, vector<1x128xf32>
    %c0_7 = arith.constant 0 : index
    %c0_8 = arith.constant 0 : index
    %4 = vector.load %arg1[%c0_7, %c0_8] : memref<2x1024xf32, #tpu.memory_space<vmem>>, vector<2x1024xf32>
    %5 = arith.truncf %4 : vector<2x1024xf32> to vector<2x1024xbf16>
    %cst = arith.constant dense<0.000000e+00> : vector<2x128xf32>
    %6 = tpu.matmul %5, %0, %cst {dimension_numbers = #tpu.dot_dimension_numbers<[1], [0], [0], [1], [0, 0, 1, 1], [], []>} : vector<2x1024xbf16>, vector<1024x128xbf16>, vector<2x128xf32> -> vector<2x128xf32>
    %7 = vector.broadcast %1 : vector<1x128xf32> to vector<2x128xf32>
    %8 = arith.addf %6, %7 : vector<2x128xf32>
    %cst_9 = arith.constant 0.000000e+00 : f32
    %9 = vector.broadcast %cst_9 : f32 to vector<2x128xf32>
    %10 = arith.maximumf %8, %9 : vector<2x128xf32>
    %11 = arith.truncf %10 : vector<2x128xf32> to vector<2x128xbf16>
    %cst_10 = arith.constant dense<0.000000e+00> : vector<2x128xf32>
    %12 = tpu.matmul %11, %2, %cst_10 {dimension_numbers = #tpu.dot_dimension_numbers<[1], [0], [0], [1], [0, 0, 1, 1], [], []>} : vector<2x128xbf16>, vector<128x128xbf16>, vector<2x128xf32> -> vector<2x128xf32>
    %13 = vector.broadcast %3 : vector<1x128xf32> to vector<2x128xf32>
    %14 = arith.addf %12, %13 : vector<2x128xf32>
    %c0_11 = arith.constant 0 : index
    %c0_12 = arith.constant 0 : index
    %15 = vector.load %arg8[%c0_11, %c0_12] : memref<2x128xf32, #tpu.memory_space<vmem>>, vector<2x128xf32>
    tpu.vector_store %arg8[%c0_11, %c0_12], %14 {strides = array<i32>} : memref<2x128xf32, #tpu.memory_space<vmem>>, vector<2x128xf32>,
    %c0_13 = arith.constant 0 : index
    %c0_14 = arith.constant 0 : index
    %16 = vector.load %arg2[%c0_13, %c0_14] : memref<2x1024xf32, #tpu.memory_space<vmem>>, vector<2x1024xf32>
    %17 = arith.truncf %16 : vector<2x1024xf32> to vector<2x1024xbf16>
    %cst_15 = arith.constant dense<0.000000e+00> : vector<2x128xf32>
    %18 = tpu.matmul %17, %0, %cst_15 {dimension_numbers = #tpu.dot_dimension_numbers<[1], [0], [0], [1], [0, 0, 1, 1], [], []>} : vector<2x1024xbf16>, vector<1024x128xbf16>, vector<2x128xf32> -> vector<2x128xf32>
    %19 = vector.broadcast %1 : vector<1x128xf32> to vector<2x128xf32>
    %20 = arith.addf %18, %19 : vector<2x128xf32>
    %cst_16 = arith.constant 0.000000e+00 : f32
    %21 = vector.broadcast %cst_16 : f32 to vector<2x128xf32>
    %22 = arith.maximumf %20, %21 : vector<2x128xf32>
    %23 = arith.truncf %22 : vector<2x128xf32> to vector<2x128xbf16>
    %cst_17 = arith.constant dense<0.000000e+00> : vector<2x128xf32>
    %24 = tpu.matmul %23, %2, %cst_17 {dimension_numbers = #tpu.dot_dimension_numbers<[1], [0], [0], [1], [0, 0, 1, 1], [], []>} : vector<2x128xbf16>, vector<128x128xbf16>, vector<2x128xf32> -> vector<2x128xf32>
    %25 = vector.broadcast %3 : vector<1x128xf32> to vector<2x128xf32>
    %26 = arith.addf %24, %25 : vector<2x128xf32>
    %c0_18 = arith.constant 0 : index
    %c0_19 = arith.constant 0 : index
    %27 = vector.load %arg9[%c0_18, %c0_19] : memref<2x128xf32, #tpu.memory_space<vmem>>, vector<2x128xf32>
    tpu.vector_store %arg9[%c0_18, %c0_19], %26 {strides = array<i32>} : memref<2x128xf32, #tpu.memory_space<vmem>>, vector<2x128xf32>,
    %c0_20 = arith.constant 0 : index
    %c0_21 = arith.constant 0 : index
    %28 = vector.load %arg3[%c0_20, %c0_21] : memref<2x1024xf32, #tpu.memory_space<vmem>>, vector<2x1024xf32>
    %29 = arith.truncf %28 : vector<2x1024xf32> to vector<2x1024xbf16>
    %cst_22 = arith.constant dense<0.000000e+00> : vector<2x128xf32>
    %30 = tpu.matmul %29, %0, %cst_22 {dimension_numbers = #tpu.dot_dimension_numbers<[1], [0], [0], [1], [0, 0, 1, 1], [], []>} : vector<2x1024xbf16>, vector<1024x128xbf16>, vector<2x128xf32> -> vector<2x128xf32>
    %31 = vector.broadcast %1 : vector<1x128xf32> to vector<2x128xf32>
    %32 = arith.addf %30, %31 : vector<2x128xf32>
    %cst_23 = arith.constant 0.000000e+00 : f32
    %33 = vector.broadcast %cst_23 : f32 to vector<2x128xf32>
    %34 = arith.maximumf %32, %33 : vector<2x128xf32>
    %35 = arith.truncf %34 : vector<2x128xf32> to vector<2x128xbf16>
    %cst_24 = arith.constant dense<0.000000e+00> : vector<2x128xf32>
    %36 = tpu.matmul %35, %2, %cst_24 {dimension_numbers = #tpu.dot_dimension_numbers<[1], [0], [0], [1], [0, 0, 1, 1], [], []>} : vector<2x128xbf16>, vector<128x128xbf16>, vector<2x128xf32> -> vector<2x128xf32>
    %37 = vector.broadcast %3 : vector<1x128xf32> to vector<2x128xf32>
    %38 = arith.addf %36, %37 : vector<2x128xf32>
    %c0_25 = arith.constant 0 : index
    %c0_26 = arith.constant 0 : index
    %39 = vector.load %arg10[%c0_25, %c0_26] : memref<2x128xf32, #tpu.memory_space<vmem>>, vector<2x128xf32>
    tpu.vector_store %arg10[%c0_25, %c0_26], %38 {strides = array<i32>} : memref<2x128xf32, #tpu.memory_space<vmem>>, vector<2x128xf32>,
    return
  }
  func.func @transform_0(%arg0: i32) -> (i32, i32) {
    %c0_i32 = arith.constant 0 : i32
    %c0_i32_0 = arith.constant 0 : i32
    return %arg0, %c0_i32 : i32, i32
  }
  func.func @transform_1(%arg0: i32) -> (i32, i32) {
    %c0_i32 = arith.constant 0 : i32
    %c0_i32_0 = arith.constant 0 : i32
    return %arg0, %c0_i32 : i32, i32
  }
  func.func @transform_2(%arg0: i32) -> (i32, i32) {
    %c0_i32 = arith.constant 0 : i32
    %c0_i32_0 = arith.constant 0 : i32
    return %arg0, %c0_i32 : i32, i32
  }
  func.func @transform_3(%arg0: i32) -> (i32, i32) {
    %c0_i32 = arith.constant 0 : i32
    %c0_i32_0 = arith.constant 0 : i32
    %c0_i32_1 = arith.constant 0 : i32
    return %c0_i32, %c0_i32_0 : i32, i32
  }
  func.func @transform_4(%arg0: i32) -> (i32, i32) {
    %c0_i32 = arith.constant 0 : i32
    %c0_i32_0 = arith.constant 0 : i32
    %c0_i32_1 = arith.constant 0 : i32
    return %c0_i32, %c0_i32_0 : i32, i32
  }
  func.func @transform_5(%arg0: i32) -> (i32, i32) {
    %c0_i32 = arith.constant 0 : i32
    %c0_i32_0 = arith.constant 0 : i32
    %c0_i32_1 = arith.constant 0 : i32
    return %c0_i32, %c0_i32_0 : i32, i32
  }
  func.func @transform_6(%arg0: i32) -> (i32, i32) {
    %c0_i32 = arith.constant 0 : i32
    %c0_i32_0 = arith.constant 0 : i32
    %c0_i32_1 = arith.constant 0 : i32
    return %c0_i32, %c0_i32_0 : i32, i32
  }
  func.func @transform_7(%arg0: i32) -> (i32, i32) {
    %c0_i32 = arith.constant 0 : i32
    %c0_i32_0 = arith.constant 0 : i32
    return %arg0, %c0_i32 : i32, i32
  }
  func.func @transform_8(%arg0: i32) -> (i32, i32) {
    %c0_i32 = arith.constant 0 : i32
    %c0_i32_0 = arith.constant 0 : i32
    return %arg0, %c0_i32 : i32, i32
  }
  func.func @transform_9(%arg0: i32) -> (i32, i32) {
    %c0_i32 = arith.constant 0 : i32
    %c0_i32_0 = arith.constant 0 : i32
    return %arg0, %c0_i32 : i32, i32
  }
}

</mosaic_0001>

<bundles_post_ra>
// kernel: tpu_custom_call.1
= control target key start
LH: loop header
LB: loop body
LE: loop exit
PB: predicated region body
PF: predicated region fallthrough
CT: control target
= control target key end

     0   :  { %15 = vsyncpa [#allocation3], 0  ;;  %s2724_s0 = inlined_call_operand.hbm [shape: f32[2,1024], index: 0, kind: input, shape index: {}]   ;;  %s2725_s1 = inlined_call_operand.hbm [shape: f32[2,1024], index: 1, kind: input, shape index: {}]   ;;  %s2726_s2 = inlined_call_operand.hbm [shape: f32[2,1024], index: 2, kind: input, shape index: {}]   ;;  %s2727_s3 = inlined_call_operand.hbm [shape: bf16[1024,128], index: 3, kind: input, shape index: {}]   ;;  %s2728_s4 = inlined_call_operand.vmem [shape: f32[1,128], index: 4, kind: input, shape index: {}]   ;;  %s2729_s5 = inlined_call_operand.hbm [shape: bf16[128,128], index: 5, kind: input, shape index: {}]   ;;  %s2730_s6 = inlined_call_operand.vmem [shape: f32[1,128], index: 6, kind: input, shape index: {}]   ;;  %s2731_s7 = inlined_call_operand.hbm [shape: f32[2,128], index: 7, kind: output, shape index: {0}]   ;;  %s2732_s8 = inlined_call_operand.hbm [shape: f32[2,128], index: 8, kind: output, shape index: {1}]   ;;  %s2733_s9 = inlined_call_operand.hbm [shape: f32[2,128], index: 9, kind: output, shape index: {2}]  }
   0x1   :  { %16 = vsyncpa [#allocation6], 0 }
   0x2   :  { %17 = vsyncpa [#allocation9], 0 }
   0x3   :  { %18 = vsyncpa [#allocation4], 0 }
   0x4   :  { %19 = vsyncpa [#allocation13], 0  ;;  %s2192_s30 = smov [#allocation5]   ;;  %s2193_s11 = smov [#allocation8]  }
   0x5   :  { %s36_s10 = sshll.u32 %s2192_s30, 4  ;;  %s55_s12 = sshll.u32 %s2193_s11, 4  ;;  %s37_s10 = int_to_ptr.vmem [resolvable:$true] %s36_s10  ;;  %s56_s12 = int_to_ptr.vmem [resolvable:$true] %s55_s12 }
   0x6   :  { %s2030_s13 = scalar_lea.vmem %s37_s10, 256  ;;  %p2035_p1 = scmp.lt.s32.totalorder %s37_s10, %s37_s10 }
   0x7   :  { %p2031_p0 = scmp.ne.s32.totalorder %s37_s10, %s2030_s13  ;;  %p2036_p2 = scmp.lt.s32.totalorder %s2030_s13, %s2030_s13 }
   0x9   :  { %p2037_p3 = por %p2036_p2, %p2035_p1 }
   0xb   :  { %p2038_p4 = pnand %p2037_p3, %p2031_p0 }
   0xd   :  { %2041 = shalt.err (!%p2038_p4)
}
   0xe   :  { %39 = dma.hbm_to_vmem [thread:$0]  %s2725_s1, 256, %s37_s10, [#allocation6]  }
   0xf   :  { %s2050_s16 = scalar_lea.vmem %s56_s12, 8192  ;;  %p2055_p6 = scmp.lt.s32.totalorder %s56_s12, %s56_s12 }
  0x10   :  { %p2051_p5 = scmp.ne.s32.totalorder %s56_s12, %s2050_s16  ;;  %p2056_p7 = scmp.lt.s32.totalorder %s2050_s16, %s2050_s16 }
  0x12   :  { %p2057_p8 = por %p2056_p7, %p2055_p6 }
  0x14   :  { %p2058_p9 = pnand %p2057_p8, %p2051_p5 }
  0x16   :  { %2061 = shalt.err (!%p2058_p9)
}
  0x17   :  { %s2194_s17 = smov 64   ;;  %s2195_s18 = smov 4  }
  0x18   :  { %61 = dma.hbm_to_vmem [thread:$0]  %s2727_s3, 8192, %s56_s12, [#allocation9], %s2194_s17, %s2194_s17, %s2195_s18  }
  0x19   :  { %s2196_s21 = smov [#allocation2]   ;;  %s2197_s23 = smov [#allocation7]  }
  0x1a   :  { %s26_s22 = sshll.u32 %s2196_s21, 4  ;;  %s46_s1 = sshll.u32 %s2197_s23, 4  ;;  %s27_s22 = int_to_ptr.vmem [resolvable:$true] %s26_s22  ;;  %s47_s1 = int_to_ptr.vmem [resolvable:$true] %s46_s1 }
  0x1b   :  { %s2070_s24 = scalar_lea.vmem %s27_s22, 256  ;;  %p2075_p11 = scmp.lt.s32.totalorder %s27_s22, %s27_s22 }
  0x1c   :  { %p2071_p10 = scmp.ne.s32.totalorder %s27_s22, %s2070_s24  ;;  %p2076_p12 = scmp.lt.s32.totalorder %s2070_s24, %s2070_s24 }
  0x1e   :  { %p2077_p13 = por %p2076_p12, %p2075_p11 }
  0x20   :  { %p2078_p0 = pnand %p2077_p13, %p2071_p10 }
  0x22   :  { %2081 = shalt.err (!%p2078_p0)
}
  0x23   :  { %29 = dma.hbm_to_vmem [thread:$0]  %s2724_s0, 256, %s27_s22, [#allocation3]  }
  0x24   :  { %s2090_s27 = scalar_lea.vmem %s47_s1, 256  ;;  %p2095_p2 = scmp.lt.s32.totalorder %s47_s1, %s47_s1 }
  0x25   :  { %p2091_p1 = scmp.ne.s32.totalorder %s47_s1, %s2090_s27  ;;  %p2096_p3 = scmp.lt.s32.totalorder %s2090_s27, %s2090_s27 }
  0x27   :  { %p2097_p4 = por %p2096_p3, %p2095_p2 }
  0x29   :  { %p2098_p5 = pnand %p2097_p4, %p2091_p1 }
  0x2b   :  { %2101 = shalt.err (!%p2098_p5)
}
  0x2c   :  { %49 = dma.hbm_to_vmem [thread:$0]  %s2726_s2, 256, %s47_s1, [#allocation6]  }
  0x2d   :  { %s2198_s29 = smov [#allocation10]  }
  0x2e   :  { %s69_s30 = sshll.u32 %s2198_s29, 4  ;;  %s70_s30 = int_to_ptr.vmem [resolvable:$true] %s69_s30 }
  0x2f   :  { %s2110_s10 = scalar_lea.vmem %s70_s30, 1024  ;;  %p2115_p7 = scmp.lt.s32.totalorder %s70_s30, %s70_s30 }
  0x30   :  { %p2111_p6 = scmp.ne.s32.totalorder %s70_s30, %s2110_s10  ;;  %p2116_p8 = scmp.lt.s32.totalorder %s2110_s10, %s2110_s10 }
  0x32   :  { %p2117_p9 = por %p2116_p8, %p2115_p7 }
  0x34   :  { %p2118_p10 = pnand %p2117_p9, %p2111_p6 }
  0x36   :  { %2121 = shalt.err (!%p2118_p10)
}
  0x37   :  { %75 = dma.hbm_to_vmem [thread:$0]  %s2729_s5, 1024, %s70_s30, [#allocation9], %s2194_s17, %s2194_s17, %s2195_s18  }
  0x38   :  { %2182 = dma.done.wait [#allocation3], 256  }
  0x39   :  { %2183 = vsyncadd [#allocation3], 4294967040 }
  0x3a   :  { %2184 = dma.done.wait [#allocation6], 512  }
  0x3b   :  { %2185 = vsyncadd [#allocation6], 4294966784 }
  0x3c   :  { %2186 = dma.done.wait [#allocation9], 9216  }
  0x3d   :  { %2187 = vsyncadd [#allocation9], 4294958080  ;;  %v2276_v0 = vld [vmem:[#allocation8 + $0x78] sm:$0xff]   ;;  %v2287_v4 = vld [vmem:[#allocation8 + $0x70] sm:$0xff]   ;;  %v2199_v22 = vmov 1983009808   ;;  %v248_v24 = vlaneseq }
  0x3e   :  { %v2278_v1 = vld [vmem:[#allocation8 + $0xf8] sm:$0xff]   ;;  %1573 = vmatprep.subr.bf16.mxu0 %v2276_v0  ;;  %v2290_v5 = vld [vmem:[#allocation8 + $0xf0] sm:$0xff]   ;;  %v2299_v8 = vld [vmem:[#allocation8 + $0x68] sm:$0xff]   ;;  %v246_v23 = vunpack.c.l.s4 %v2199_v22  ;;  %vm2201_vm0 = vmmov 0   ;;  %s2203_s14 = smov [#allocation11]  }
  0x3f   :  { %v2281_v2 = vld [vmem:[#allocation8 + $0x38] sm:$0xff]   ;;  %1595 = vmatprep.subr.bf16.mxu1 %v2278_v1  ;;  %v2293_v6 = vld [vmem:[#allocation8 + $0x30] sm:$0xff]   ;;  %v2302_v9 = vld [vmem:[#allocation8 + $0xe8] sm:$0xff]   ;;  %v249_v30 = vshrl.u32 %v248_v24, 7  ;;  %s1461_s15 = sshll.u32 %s2203_s14, 4  ;;  %s1462_s15 = int_to_ptr.vmem [resolvable:$true] %s1461_s15 }
  0x40   :  { %v2284_v3 = vld [vmem:[#allocation8 + $0xb8] sm:$0xff]   ;;  %1574 = vmatpush3.bf16.msra.mxu0 %v2281_v2  ;;  %v2296_v7 = vld [vmem:[#allocation8 + $0xb0] sm:$0xff]   ;;  %v2305_v10 = vld [vmem:[#allocation8 + $0x28] sm:$0xff]   ;;  %v247_v29 = vunpack.c.0.s8 %v246_v23 }
  0x41   :  { %1596 = vmatpush3.bf16.msra.mxu1 %v2284_v3  ;;  %1575 = vmatprep.subr.bf16.mxu0 %v2287_v4  ;;  %v2308_v11 = vld [vmem:[#allocation8 + $0xa8] sm:$0xff]   ;;  %v2311_v12 = vld [vmem:[#allocation8 + $0x60] sm:$0xff]   ;;  %v2323_v16 = vld [vmem:[#allocation8 + $0x58] sm:$0xff]  }
  0x42   :  { %1597 = vmatprep.subr.bf16.mxu1 %v2290_v5  ;;  %v2314_v13 = vld [vmem:[#allocation8 + $0xe0] sm:$0xff]   ;;  %v2326_v17 = vld [vmem:[#allocation8 + $0xd8] sm:$0xff]   ;;  %v2335_v20 = vld [vmem:[#allocation8 + $0x50] sm:$0xff]   ;;  %v2364_v35 = vsub.s32 %v247_v29, %v249_v30 }
  0x43   :  { %v2317_v14 = vld [vmem:[#allocation8 + $0x20] sm:$0xff]   ;;  %v2329_v18 = vld [vmem:[#allocation8 + $0x18] sm:$0xff]   ;;  %v2338_v21 = vld [vmem:[#allocation8 + $0xd0] sm:$0xff]  }
  0x44   :  { %1576 = vmatpush3.bf16.msra.mxu0 %v2293_v6  ;;  %v2320_v15 = vld [vmem:[#allocation8 + $0xa0] sm:$0xff]   ;;  %v2332_v19 = vld [vmem:[#allocation8 + $0x98] sm:$0xff]   ;;  %v2341_v25 = vld [vmem:[#allocation8 + $0x10] sm:$0xff]  }
  0x45   :  { %1598 = vmatpush3.bf16.msra.mxu1 %v2296_v7  ;;  %1577 = vmatprep.subr.bf16.mxu0 %v2299_v8  ;;  %v2344_v26 = vld [vmem:[#allocation8 + $0x90] sm:$0xff]   ;;  %v2347_v27 = vld [vmem:[#allocation8 + $0x48] sm:$0xff]   ;;  %v2359_v33 = vld [vmem:[#allocation8 + $0x40] sm:$0xff]  }
  0x46   :  { %1599 = vmatprep.subr.bf16.mxu1 %v2302_v9  ;;  %v2350_v28 = vld [vmem:[#allocation8 + $0xc8] sm:$0xff]   ;;  %2782 = vst [vmem:[#allocation21_spill] sm:$0xff] %v2359_v33  ;;  %v2362_v34 = vld [vmem:[#allocation8 + $0xc0] sm:$0xff]   ;;  %v240_v38 = vld [vmem:[#allocation2] sm:$0xff] }
  0x47   :  { %v2353_v31 = vld [vmem:[#allocation8 + $0x8] sm:$0xff]   ;;  %v2367_v36 = vld [vmem:[#allocation8] sm:$0xff]   ;;  %v251_v39 = vrot.slane %v240_v38, %v2364_v35  ;;  %v244_v40 = vcombine.high %v240_v38, %v240_v38  ;;  %v2375_v41 = vld [vmem:[#allocation8 + $0x178] sm:$0xff]  }
  0x48   :  { %1578 = vmatpush3.bf16.msra.mxu0 %v2305_v10  ;;  %2781 = vst [vmem:[#allocation20_spill] sm:$0xff] %v2353_v31  ;;  %v2356_v32 = vld [vmem:[#allocation8 + $0x88] sm:$0xff]   ;;  %2783 = vst [vmem:[#allocation22_spill] sm:$0xff] %v2367_v36  ;;  %v2370_v37 = vld [vmem:[#allocation8 + $0x80] sm:$0xff]  }
  0x49   :  { %1600 = vmatpush3.bf16.msra.mxu1 %v2308_v11  ;;  %1579 = vmatprep.subr.bf16.mxu0 %v2311_v12  ;;  %2784 = vst [vmem:[#allocation23_spill] sm:$0xff] %v2375_v41  ;;  %v2377_v42 = vld [vmem:[#allocation8 + $0x1f8] sm:$0xff]   ;;  %v259_v43 = vcombine.high %v251_v39, %v251_v39  ;;  %v258_v44 = vrot.slane %v244_v40, %v2364_v35  ;;  %v2386_v51 = vld [vmem:[#allocation8 + $0x170] sm:$0xff]   ;;  %v2396_v56 = vld [vmem:[#allocation8 + $0x168] sm:$0xff]  }
  0x4a   :  { %1601 = vmatprep.subr.bf16.mxu1 %v2314_v13  ;;  %v286_v45 = vpack.c.bf16 %v251_v39, %v251_v39  ;;  %v2382_v46 = vld [vmem:[#allocation8 + $0x138] sm:$0xff]   ;;  %v2388_v53 = vld [vmem:[#allocation8 + $0x1f0] sm:$0xff]   ;;  %v2399_v57 = vld [vmem:[#allocation8 + $0x1e8] sm:$0xff]  }
  0x4b   :  { %v287_v47 = vpack.c.bf16 %v259_v43, %v259_v43  ;;  %v260_v48 = vcombine.high %v258_v44, %v258_v44  ;;  %v2384_v49 = vld [vmem:[#allocation8 + $0x1b8] sm:$0xff]   ;;  %v288_v50 = vpack.c.bf16 %v258_v44, %v258_v44  ;;  %2785 = vst [vmem:[#allocation24_spill] sm:$0xff] %v2388_v53  ;;  %v2390_v54 = vld [vmem:[#allocation8 + $0x130] sm:$0xff]   ;;  %2787 = vst [vmem:[#allocation26_spill] sm:$0xff] %v2399_v57 }
  0x4c   :  { %1580 = vmatpush3.bf16.msra.mxu0 %v2317_v14  ;;  %v2393_v55 = vld [vmem:[#allocation8 + $0x1b0] sm:$0xff]   ;;  %v2402_v58 = vld [vmem:[#allocation8 + $0x128] sm:$0xff]   ;;  %v2408_v60 = vld [vmem:[#allocation8 + $0x160] sm:$0xff]  }
  0x4d   :  { %1602 = vmatpush3.bf16.msra.mxu1 %v2320_v15  ;;  %1581 = vmatprep.subr.bf16.mxu0 %v2323_v16  ;;  %v289_v52 = vpack.c.bf16 %v260_v48, %v260_v48  ;;  %2786 = vst [vmem:[#allocation25_spill] sm:$0xff] %v2393_v55  ;;  %v2405_v59 = vld [vmem:[#allocation8 + $0x1a8] sm:$0xff]   ;;  %2789 = vst [vmem:[#allocation28_spill] sm:$0xff] %v2408_v60  ;;  %v2411_v61 = vld [vmem:[#allocation8 + $0x1e0] sm:$0xff]  }
  0x4e   :  { %1603 = vmatprep.subr.bf16.mxu1 %v2326_v17  ;;  %716 = vmatprep.mubr.bf16.mxu0 %v287_v47  ;;  %2788 = vst [vmem:[#allocation27_spill] sm:$0xff] %v2405_v59  ;;  %2790 = vst [vmem:[#allocation29_spill] sm:$0xff] %v2411_v61  ;;  %v2414_v62 = vld [vmem:[#allocation8 + $0x120] sm:$0xff]   ;;  %v2420_v22 = vld [vmem:[#allocation8 + $0x158] sm:$0xff]  }
  0x4f   :  { %756 = vmatprep.mubr.bf16.mxu1 %v289_v52  ;;  %2791 = vst [vmem:[#allocation30_spill] sm:$0xff] %v2414_v62  ;;  %v2417_v63 = vld [vmem:[#allocation8 + $0x1a0] sm:$0xff]   ;;  %2793 = vst [vmem:[#allocation32_spill] sm:$0xff] %v2420_v22  ;;  %v2423_v23 = vld [vmem:[#allocation8 + $0x1d8] sm:$0xff]  }
  0x50   :  { %1582 = vmatpush3.bf16.msra.mxu0 %v2329_v18  ;;  %2792 = vst [vmem:[#allocation31_spill] sm:$0xff] %v2417_v63  ;;  %2794 = vst [vmem:[#allocation33_spill] sm:$0xff] %v2423_v23  ;;  %v2426_v24 = vld [vmem:[#allocation8 + $0x118] sm:$0xff]   ;;  %v2432_v30 = vld [vmem:[#allocation8 + $0x150] sm:$0xff]  }
  0x51   :  { %1604 = vmatpush3.bf16.msra.mxu1 %v2332_v19  ;;  %1583 = vmatprep.subr.bf16.mxu0 %v2335_v20  ;;  %2795 = vst [vmem:[#allocation34_spill] sm:$0xff] %v2426_v24  ;;  %v2429_v29 = vld [vmem:[#allocation8 + $0x198] sm:$0xff]   ;;  %2797 = vst [vmem:[#allocation36_spill] sm:$0xff] %v2432_v30  ;;  %v2435_v38 = vld [vmem:[#allocation8 + $0x1d0] sm:$0xff]  }
  0x52   :  { %1605 = vmatprep.subr.bf16.mxu1 %v2338_v21  ;;  %2796 = vst [vmem:[#allocation35_spill] sm:$0xff] %v2429_v29  ;;  %2798 = vst [vmem:[#allocation37_spill] sm:$0xff] %v2435_v38  ;;  %v2438_v39 = vld [vmem:[#allocation8 + $0x110] sm:$0xff]   ;;  %v2444_v43 = vld [vmem:[#allocation8 + $0x148] sm:$0xff]  }
  0x53   :  { %2799 = vst [vmem:[#allocation38_spill] sm:$0xff] %v2438_v39  ;;  %v2441_v40 = vld [vmem:[#allocation8 + $0x190] sm:$0xff]   ;;  %2801 = vst [vmem:[#allocation40_spill] sm:$0xff] %v2444_v43  ;;  %v2447_v44 = vld [vmem:[#allocation8 + $0x1c8] sm:$0xff]  }
  0x54   :  { %1584 = vmatpush3.bf16.msra.mxu0 %v2341_v25  ;;  %2800 = vst [vmem:[#allocation39_spill] sm:$0xff] %v2441_v40  ;;  %2802 = vst [vmem:[#allocation41_spill] sm:$0xff] %v2447_v44  ;;  %v2453_v47 = vld [vmem:[#allocation8 + $0x188] sm:$0xff]   ;;  %v2456_v48 = vld [vmem:[#allocation8 + $0x140] sm:$0xff]  }
  0x55   :  { %1606 = vmatpush3.bf16.msra.mxu1 %v2344_v26  ;;  %1585 = vmatprep.subr.bf16.mxu0 %v2347_v27  ;;  %2804 = vst [vmem:[#allocation43_spill] sm:$0xff] %v2456_v48  ;;  %v2462_v52 = vld [vmem:[#allocation8 + $0x100] sm:$0xff]  }
  0x56   :  { %1607 = vmatprep.subr.bf16.mxu1 %v2350_v28  ;;  %2805 = vst [vmem:[#allocation44_spill] sm:$0xff] %v2462_v52 }
  0x58   :  { %1586 = vmatpush3.bf16.msra.mxu0 %v2353_v31 }
  0x59   :  { %1608 = vmatpush3.bf16.msra.mxu1 %v2356_v32  ;;  %1587 = vmatprep.subr.bf16.mxu0 %v2359_v33 }
  0x5a   :  { %1609 = vmatprep.subr.bf16.mxu1 %v2362_v34 }
  0x5c   :  { %1588 = vmatpush3.bf16.msra.mxu0 %v2367_v36 }
  0x5d   :  { %1610 = vmatpush3.bf16.msra.mxu1 %v2370_v37  ;;  %1617 = vmatprep.subr.bf16.mxu0 %v2375_v41 }
  0x5e   :  { %1639 = vmatprep.subr.bf16.mxu1 %v2377_v42 }
  0x5f   :  { %717 = vmatmul.mubr.bf16.vlgmr.msra.gmra.mxu0 %v286_v45  ;;  %v2450_v45 = vld [vmem:[#allocation8 + $0x108] sm:$0xff]  }
  0x60   :  { %1618 = vmatpush3.bf16.msra.mxu0 %v2382_v46  ;;  %757 = vmatmul.mubr.bf16.vlgmr.msra.gmra.mxu1 %v288_v50  ;;  %2803 = vst [vmem:[#allocation42_spill] sm:$0xff] %v2450_v45  ;;  %v2459_v50 = vld [vmem:[#allocation8 + $0x1c0] sm:$0xff]  }
  0x61   :  { %1619 = vmatprep.subr.bf16.mxu0 %v2386_v51  ;;  %1640 = vmatpush3.bf16.msra.mxu1 %v2384_v49 }
  0x62   :  { %1641 = vmatprep.subr.bf16.mxu1 %v2388_v53 }
  0x64   :  { %1620 = vmatpush3.bf16.msra.mxu0 %v2390_v54 }
  0x65   :  { %1621 = vmatprep.subr.bf16.mxu0 %v2396_v56  ;;  %1642 = vmatpush3.bf16.msra.mxu1 %v2393_v55 }
  0x66   :  { %1643 = vmatprep.subr.bf16.mxu1 %v2399_v57 }
  0x68   :  { %1622 = vmatpush3.bf16.msra.mxu0 %v2402_v58 }
  0x69   :  { %1623 = vmatprep.subr.bf16.mxu0 %v2408_v60  ;;  %1644 = vmatpush3.bf16.msra.mxu1 %v2405_v59 }
  0x6a   :  { %1645 = vmatprep.subr.bf16.mxu1 %v2411_v61 }
  0x6c   :  { %1624 = vmatpush3.bf16.msra.mxu0 %v2414_v62 }
  0x6d   :  { %1625 = vmatprep.subr.bf16.mxu0 %v2420_v22  ;;  %1646 = vmatpush3.bf16.msra.mxu1 %v2417_v63 }
  0x6e   :  { %1647 = vmatprep.subr.bf16.mxu1 %v2423_v23 }
  0x70   :  { %1626 = vmatpush3.bf16.msra.mxu0 %v2426_v24 }
  0x71   :  { %1627 = vmatprep.subr.bf16.mxu0 %v2432_v30  ;;  %1648 = vmatpush3.bf16.msra.mxu1 %v2429_v29  ;;  %v241_v29 = vld [vmem:[#allocation2 + $0x8] sm:$0xff] }
  0x72   :  { %1649 = vmatprep.subr.bf16.mxu1 %v2435_v38  ;;  %v2465_v38 = vld [vmem:[#allocation8 + $0x180] sm:$0xff]   ;;  %v268_v23 = vrot.slane %v241_v29, %v2364_v35  ;;  %v261_v63 = vcombine.high %v241_v29, %v241_v29  ;;  %v2516_v29 = vld [vmem:[#allocation10 + $0x8] sm:$0xff]  }
  0x73   :  { %2812 = vst [vmem:[#allocation51_spill] sm:$0xff] %v2516_v29 }
  0x74   :  { %1628 = vmatpush3.bf16.msra.mxu0 %v2438_v39  ;;  %v276_v61 = vcombine.high %v268_v23, %v268_v23 }
  0x75   :  { %1629 = vmatprep.subr.bf16.mxu0 %v2444_v43  ;;  %1650 = vmatpush3.bf16.msra.mxu1 %v2441_v40  ;;  %v275_v40 = vrot.slane %v261_v63, %v2364_v35  ;;  %v2507_v63 = vld [vmem:[#allocation10 + $0x18] sm:$0xff]  }
  0x76   :  { %1651 = vmatprep.subr.bf16.mxu1 %v2447_v44  ;;  %v290_v44 = vpack.c.bf16 %v268_v23, %v268_v23  ;;  %v291_v59 = vpack.c.bf16 %v276_v61, %v276_v61  ;;  %v2503_v61 = vld [vmem:[#allocation10 + $0x20] sm:$0xff]   ;;  %2810 = vst [vmem:[#allocation49_spill] sm:$0xff] %v2507_v63  ;;  %v2512_v23 = vld [vmem:[#allocation10 + $0x10] sm:$0xff]  }
  0x77   :  { %v277_v57 = vcombine.high %v275_v40, %v275_v40  ;;  %v292_v55 = vpack.c.bf16 %v275_v40, %v275_v40  ;;  %2809 = vst [vmem:[#allocation48_spill] sm:$0xff] %v2503_v61  ;;  %2811 = vst [vmem:[#allocation50_spill] sm:$0xff] %v2512_v23  ;;  %v2520_v40 = vld [vmem:[#allocation10] sm:$0xff]  }
  0x78   :  { %1630 = vmatpush3.bf16.msra.mxu0 %v2450_v45  ;;  %796 = vmatprep.mubr.bf16.mxu0 %v291_v59  ;;  %v2499_v59 = vld [vmem:[#allocation10 + $0x28] sm:$0xff]   ;;  %2813 = vst [vmem:[#allocation52_spill] sm:$0xff] %v2520_v40 }
  0x79   :  { %1631 = vmatprep.subr.bf16.mxu0 %v2456_v48  ;;  %1652 = vmatpush3.bf16.msra.mxu1 %v2453_v47  ;;  %v293_v53 = vpack.c.bf16 %v277_v57, %v277_v57  ;;  %v2495_v57 = vld [vmem:[#allocation10 + $0x30] sm:$0xff]   ;;  %2808 = vst [vmem:[#allocation47_spill] sm:$0xff] %v2499_v59 }
  0x7a   :  { %1653 = vmatprep.subr.bf16.mxu1 %v2459_v50  ;;  %2807 = vst [vmem:[#allocation46_spill] sm:$0xff] %v2495_v57 }
  0x7b   :  { %836 = vmatprep.mubr.bf16.mxu1 %v293_v53  ;;  %v2491_v53 = vld [vmem:[#allocation10 + $0x38] sm:$0xff]  }
  0x7c   :  { %1632 = vmatpush3.bf16.msra.mxu0 %v2462_v52  ;;  %2806 = vst [vmem:[#allocation45_spill] sm:$0xff] %v2491_v53 }
  0x7d   :  { %1654 = vmatpush3.bf16.msra.mxu1 %v2465_v38 }
  0x7e   :  { %1670 = vmatprep.subr.bf16.mxu1 %v2276_v0 }
  0x7f   :  { %797 = vmatmul.mubr.bf16.vlgmr.msra.gmra.mxu0 %v290_v44  ;;  %v2522_v44 = vld [vmem:[#allocation5] sm:$0xff] }
  0x80   :  { %837 = vmatmul.mubr.bf16.vlgmr.msra.gmra.mxu1 %v292_v55  ;;  %v2760_v55 = vmov 0.0  }
  0x81   :  { %1671 = vmatpush3.bf16.msra.mxu1 %v2281_v2  ;;  %1864 = vmatprep.subr.bf16.mxu0 %v2760_v55 }
  0x82   :  { %1672 = vmatprep.subr.bf16.mxu1 %v2287_v4  ;;  %1865 = vmatpush3.bf16.msra.mxu0 %v2491_v53 }
  0x83   :  { %1866 = vmatprep.subr.bf16.mxu0 %v2760_v55  ;;  %1880 = vmatprep.mubr.msk.bf16.mxu0 %vm2201_vm0, %v2760_v55 }
  0x85   :  { %1673 = vmatpush3.bf16.msra.mxu1 %v2293_v6 }
  0x86   :  { %1674 = vmatprep.subr.bf16.mxu1 %v2299_v8  ;;  %1867 = vmatpush3.bf16.msra.mxu0 %v2495_v57 }
  0x87   :  { %1868 = vmatprep.subr.bf16.mxu0 %v2760_v55 }
  0x89   :  { %1675 = vmatpush3.bf16.msra.mxu1 %v2305_v10 }
  0x8a   :  { %1676 = vmatprep.subr.bf16.mxu1 %v2311_v12  ;;  %1869 = vmatpush3.bf16.msra.mxu0 %v2499_v59 }
  0x8b   :  { %1870 = vmatprep.subr.bf16.mxu0 %v2760_v55 }
  0x8d   :  { %1677 = vmatpush3.bf16.msra.mxu1 %v2317_v14 }
  0x8e   :  { %1678 = vmatprep.subr.bf16.mxu1 %v2323_v16  ;;  %1871 = vmatpush3.bf16.msra.mxu0 %v2503_v61 }
  0x8f   :  { %1872 = vmatprep.subr.bf16.mxu0 %v2760_v55 }
  0x91   :  { %1679 = vmatpush3.bf16.msra.mxu1 %v2329_v18 }
  0x92   :  { %1680 = vmatprep.subr.bf16.mxu1 %v2335_v20  ;;  %1873 = vmatpush3.bf16.msra.mxu0 %v2507_v63 }
  0x93   :  { %1874 = vmatprep.subr.bf16.mxu0 %v2760_v55 }
  0x95   :  { %1681 = vmatpush3.bf16.msra.mxu1 %v2341_v25 }
  0x96   :  { %1682 = vmatprep.subr.bf16.mxu1 %v2347_v27  ;;  %1875 = vmatpush3.bf16.msra.mxu0 %v2512_v23 }
  0x97   :  { %1876 = vmatprep.subr.bf16.mxu0 %v2760_v55 }
  0x99   :  { %1683 = vmatpush3.bf16.msra.mxu1 %v2353_v31 }
  0x9a   :  { %1684 = vmatprep.subr.bf16.mxu1 %v2359_v33  ;;  %1877 = vmatpush3.bf16.msra.mxu0 %v2516_v29 }
  0x9b   :  { %1878 = vmatprep.subr.bf16.mxu0 %v2760_v55 }
  0x9d   :  { %1685 = vmatpush3.bf16.msra.mxu1 %v2367_v36 }
  0x9e   :  { %1714 = vmatprep.subr.bf16.mxu1 %v2375_v41  ;;  %v952_v41 = vrot.slane %v2522_v44, %v2364_v35  ;;  %1879 = vmatpush3.bf16.msra.mxu0 %v2520_v40 }
  0x9f   :  { %1692 = vmatprep.subr.bf16.mxu0 %v2278_v1 }
  0xa0   :  { %v960_v36 = vcombine.high %v952_v41, %v952_v41  ;;  %v987_v31 = vpack.c.bf16 %v952_v41, %v952_v41 }
  0xa2   :  { %v988_v33 = vpack.c.bf16 %v960_v36, %v960_v36 }
  0xa4   :  { %1027 = vmatprep.mubr.bf16.mxu1 %v988_v33 }
  0xa5   :  { %1028 = vmatmul.mubr.bf16.vlgmr.msra.gmra.mxu1 %v987_v31  ;;  %v2542_v31 = vld [vmem:[#allocation5 + $0x8] sm:$0xff] }
  0xa6   :  { %1715 = vmatpush3.bf16.msra.mxu1 %v2382_v46  ;;  %v969_v33 = vrot.slane %v2542_v31, %v2364_v35 }
  0xa7   :  { %1716 = vmatprep.subr.bf16.mxu1 %v2386_v51 }
  0xa8   :  { %v977_v36 = vcombine.high %v969_v33, %v969_v33  ;;  %v991_v55 = vpack.c.bf16 %v969_v33, %v969_v33 }
  0xaa   :  { %1717 = vmatpush3.bf16.msra.mxu1 %v2390_v54  ;;  %v992_v41 = vpack.c.bf16 %v977_v36, %v977_v36 }
  0xab   :  { %1718 = vmatprep.subr.bf16.mxu1 %v2396_v56 }
  0xac   :  { %1107 = vmatprep.mubr.bf16.mxu1 %v992_v41 }
  0xae   :  { %1719 = vmatpush3.bf16.msra.mxu1 %v2402_v58 }
  0xaf   :  { %1720 = vmatprep.subr.bf16.mxu1 %v2408_v60 }
  0xb2   :  { %1721 = vmatpush3.bf16.msra.mxu1 %v2414_v62 }
  0xb3   :  { %1722 = vmatprep.subr.bf16.mxu1 %v2420_v22 }
  0xb6   :  { %1723 = vmatpush3.bf16.msra.mxu1 %v2426_v24 }
  0xb7   :  { %1724 = vmatprep.subr.bf16.mxu1 %v2432_v30  ;;  %v2814_v30 = vmov 0.0  }
  0xba   :  { %1725 = vmatpush3.bf16.msra.mxu1 %v2438_v39 }
  0xbb   :  { %1726 = vmatprep.subr.bf16.mxu1 %v2444_v43 }
  0xbe   :  { %1727 = vmatpush3.bf16.msra.mxu1 %v2450_v45 }
  0xbf   :  { %1728 = vmatprep.subr.bf16.mxu1 %v2456_v48 }
  0xc2   :  { %1729 = vmatpush3.bf16.msra.mxu1 %v2462_v52 }
  0xc3   :  { %1884 = vmatprep.subr.bf16.mxu1 %v2814_v30 }
  0xc5   :  { %1108 = vmatmul.mubr.bf16.vlgmr.msra.gmra.mxu1 %v991_v55 }
  0xc6   :  { %1885 = vmatpush3.bf16.msra.mxu1 %v2491_v53  ;;  %1900 = vmatprep.mubr.msk.bf16.mxu1 %vm2201_vm0, %v2814_v30 }
  0xc7   :  { %1886 = vmatprep.subr.bf16.mxu1 %v2814_v30 }
  0xca   :  { %1887 = vmatpush3.bf16.msra.mxu1 %v2495_v57 }
  0xcb   :  { %1888 = vmatprep.subr.bf16.mxu1 %v2814_v30 }
  0xce   :  { %1889 = vmatpush3.bf16.msra.mxu1 %v2499_v59 }
  0xcf   :  { %1890 = vmatprep.subr.bf16.mxu1 %v2814_v30 }
  0xd2   :  { %1891 = vmatpush3.bf16.msra.mxu1 %v2503_v61 }
  0xd3   :  { %1892 = vmatprep.subr.bf16.mxu1 %v2814_v30 }
  0xd6   :  { %1893 = vmatpush3.bf16.msra.mxu1 %v2507_v63 }
  0xd7   :  { %1894 = vmatprep.subr.bf16.mxu1 %v2814_v30 }
  0xda   :  { %1895 = vmatpush3.bf16.msra.mxu1 %v2512_v23  ;;  %v2571_v23 = vld [vmem:[%s2728_s4] ss:$0 sm:$0xff] }
  0xdb   :  { %1896 = vmatprep.subr.bf16.mxu1 %v2814_v30 }
  0xde   :  { %1897 = vmatpush3.bf16.msra.mxu1 %v2516_v29  ;;  %v945_v29 = vcombine.high %v2522_v44, %v2522_v44 }
  0xdf   :  { %1898 = vmatprep.subr.bf16.mxu1 %v2814_v30 }
  0xe2   :  { %1899 = vmatpush3.bf16.msra.mxu1 %v2520_v40 }
  0xe3   :  { %1789 = vmatprep.subr.bf16.mxu1 %v2278_v1 }
 0x11f   :  { %v1589_v55 = vpop.f32.mrf.mxu0 }
 0x120   :  { %v1611_v33 = vpop.f32.mrf.mxu1 }
 0x121   :  { %v1590_v36 = vpop.f32.mrf.mxu0 }
 0x122   :  { %v1612_v41 = vpop.f32.mrf.mxu1  ;;  %v1591_v53 = vadd.f32 %v1590_v36, %v1589_v55 }
 0x123   :  { %v1592_v61 = vpop.f32.mrf.mxu0  ;;  %v1613_v1 = vadd.f32 %v1612_v41, %v1611_v33 }
 0x124   :  { %v1614_v63 = vpop.f32.mrf.mxu1  ;;  %v719_v40 = vadd.f32 %v1591_v53, %v2571_v23  ;;  %v959_v61 = vrot.slane %v945_v29, %v2364_v35 }
 0x125   :  { %v1593_v59 = vpop.f32.mrf.mxu0 }
 0x126   :  { %v1615_v57 = vpop.f32.mrf.mxu1  ;;  %v759_v63 = vadd.f32 %v1613_v1, %v719_v40  ;;  %v961_v24 = vcombine.high %v959_v61, %v959_v61 }
 0x128   :  { %v990_v60 = vpack.c.bf16 %v961_v24, %v961_v24  ;;  %v2820_v24 = vld [vmem:[#allocation31_spill] sm:$0xff] }
 0x13f   :  { %v1633_v30 = vpop.f32.mrf.mxu0 }
 0x140   :  { %v1655_v52 = vpop.f32.mrf.mxu1 }
 0x141   :  { %v1634_v48 = vpop.f32.mrf.mxu0 }
 0x142   :  { %v1635_v59 = vadd.f32 %v1634_v48, %v1633_v30  ;;  %v1656_v57 = vpop.f32.mrf.mxu1  ;;  %v2821_v30 = vld [vmem:[#allocation33_spill] sm:$0xff] }
 0x143   :  { %v1636_v55 = vpop.f32.mrf.mxu0  ;;  %v1657_v45 = vadd.f32 %v1656_v57, %v1655_v52  ;;  %v2825_v48 = vld [vmem:[#allocation41_spill] sm:$0xff]  ;;  %v2833_v57 = vld [vmem:[#allocation34_spill] sm:$0xff] }
 0x144   :  { %v799_v36 = vadd.f32 %v1635_v59, %v759_v63  ;;  %v1658_v43 = vpop.f32.mrf.mxu1  ;;  %v2831_v63 = vld [vmem:[#allocation30_spill] sm:$0xff]  ;;  %v2832_v59 = vld [vmem:[#allocation32_spill] sm:$0xff] }
 0x145   :  { %v1637_v39 = vpop.f32.mrf.mxu0  ;;  %v2823_v43 = vld [vmem:[#allocation37_spill] sm:$0xff]  ;;  %v2834_v55 = vld [vmem:[#allocation36_spill] sm:$0xff] }
 0x146   :  { %v839_v22 = vadd.f32 %v1657_v45, %v799_v36  ;;  %v1659_v62 = vpop.f32.mrf.mxu1  ;;  %v2822_v39 = vld [vmem:[#allocation35_spill] sm:$0xff]  ;;  %v2835_v36 = vld [vmem:[#allocation38_spill] sm:$0xff] }
 0x147   :  { %v2818_v62 = vld [vmem:[#allocation27_spill] sm:$0xff] }
 0x148   :  { %v844_v44 = vmax.f32 %v839_v22, 0.0  ;;  %v2819_v22 = vld [vmem:[#allocation29_spill] sm:$0xff]  ;;  %v2824_v45 = vld [vmem:[#allocation39_spill] sm:$0xff] }
 0x14a   :  { %v845_v53 = vpack.c.bf16 %v844_v44, %v844_v44 }
 0x14c   :  { %1881 = vmatmul.mubr.bf16.vlgmr.msra.gmra.mxu0 %v845_v53 }
 0x14d   :  { %1693 = vmatpush3.bf16.msra.mxu0 %v2284_v3  ;;  %1067 = vmatprep.mubr.bf16.mxu0 %v990_v60  ;;  %v962_v3 = vcombine.high %v2542_v31, %v2542_v31  ;;  %v2817_v60 = vld [vmem:[#allocation26_spill] sm:$0xff] }
 0x14e   :  { %1694 = vmatprep.subr.bf16.mxu0 %v2290_v5 }
 0x14f   :  { %v976_v5 = vrot.slane %v962_v3, %v2364_v35  ;;  %v2839_v3 = vld [vmem:[#allocation44_spill] sm:$0xff] }
 0x151   :  { %1695 = vmatpush3.bf16.msra.mxu0 %v2296_v7  ;;  %v978_v7 = vcombine.high %v976_v5, %v976_v5  ;;  %v993_v52 = vpack.c.bf16 %v976_v5, %v976_v5 }
 0x152   :  { %1696 = vmatprep.subr.bf16.mxu0 %v2302_v9  ;;  %v989_v9 = vpack.c.bf16 %v959_v61, %v959_v61  ;;  %v2830_v61 = vld [vmem:[#allocation28_spill] sm:$0xff] }
 0x155   :  { %1697 = vmatpush3.bf16.msra.mxu0 %v2308_v11  ;;  %v994_v11 = vpack.c.bf16 %v978_v7, %v978_v7  ;;  %v2840_v7 = vmov 0.0  }
 0x156   :  { %1698 = vmatprep.subr.bf16.mxu0 %v2314_v13  ;;  %v2815_v13 = vld [vmem:[#allocation24_spill] sm:$0xff] }
 0x159   :  { %1699 = vmatpush3.bf16.msra.mxu0 %v2320_v15  ;;  %v2816_v15 = vld [vmem:[#allocation25_spill] sm:$0xff] }
 0x15a   :  { %1700 = vmatprep.subr.bf16.mxu0 %v2326_v17 }
 0x15d   :  { %1701 = vmatpush3.bf16.msra.mxu0 %v2332_v19 }
 0x15e   :  { %1702 = vmatprep.subr.bf16.mxu0 %v2338_v21 }
 0x161   :  { %1703 = vmatpush3.bf16.msra.mxu0 %v2344_v26 }
 0x162   :  { %1704 = vmatprep.subr.bf16.mxu0 %v2350_v28 }
 0x165   :  { %1705 = vmatpush3.bf16.msra.mxu0 %v2356_v32  ;;  %v1686_v29 = vpop.f32.mrf.mxu1 }
 0x166   :  { %1706 = vmatprep.subr.bf16.mxu0 %v2362_v34 }
 0x167   :  { %v1687_v40 = vpop.f32.mrf.mxu1 }
 0x168   :  { %v2616_v31 = vadd.f32 %v1687_v40, %v1686_v29  ;;  %v2844_v29 = vld [vmem:[#allocation48_spill] sm:$0xff]  ;;  %v2669_v40 = vld [vmem:[%s2730_s6] ss:$0 sm:$0xff]  ;;  %s2202_s6 = smov [#allocation12]  }
 0x169   :  { %1707 = vmatpush3.bf16.msra.mxu0 %v2370_v37  ;;  %v1689_v33 = vpop.f32.mrf.mxu1  ;;  %s1471_s13 = sshll.u32 %s2202_s6, 4  ;;  %s1472_s13 = int_to_ptr.vmem [resolvable:$true] %s1471_s13 }
 0x16a   :  { %1736 = vmatprep.subr.bf16.mxu0 %v2377_v42  ;;  %v2845_v33 = vld [vmem:[#allocation49_spill] sm:$0xff]  ;;  %s2122_s16 = scalar_lea.vmem %s1472_s13, 32  ;;  %p2127_p12 = scmp.lt.s32.totalorder %s1472_s13, %s1472_s13 }
 0x16b   :  { %v1690_v41 = vpop.f32.mrf.mxu1  ;;  %p2123_p11 = scmp.ne.s32.totalorder %s1472_s13, %s2122_s16  ;;  %p2128_p13 = scmp.lt.s32.totalorder %s2122_s16, %s2122_s16 }
 0x16c   :  { %1068 = vmatmul.mubr.bf16.vlgmr.msra.gmra.mxu0 %v989_v9  ;;  %v2841_v9 = vld [vmem:[#allocation45_spill] sm:$0xff] }
 0x16d   :  { %1737 = vmatpush3.bf16.msra.mxu0 %v2384_v49  ;;  %1147 = vmatprep.mubr.bf16.mxu0 %v994_v11  ;;  %v2842_v11 = vld [vmem:[#allocation46_spill] sm:$0xff]  ;;  %p2129_p0 = por %p2128_p13, %p2127_p12 }
 0x16e   :  { %1738 = vmatprep.subr.bf16.mxu0 %v2815_v13 }
 0x16f   :  { %p2130_p1 = pnand %p2129_p0, %p2123_p11 }
 0x171   :  { %1739 = vmatpush3.bf16.msra.mxu0 %v2816_v15 }
 0x172   :  { %1740 = vmatprep.subr.bf16.mxu0 %v2817_v60 }
 0x175   :  { %1741 = vmatpush3.bf16.msra.mxu0 %v2818_v62 }
 0x176   :  { %1742 = vmatprep.subr.bf16.mxu0 %v2819_v22 }
 0x179   :  { %1743 = vmatpush3.bf16.msra.mxu0 %v2820_v24 }
 0x17a   :  { %1744 = vmatprep.subr.bf16.mxu0 %v2821_v30 }
 0x17d   :  { %1745 = vmatpush3.bf16.msra.mxu0 %v2822_v39 }
 0x17e   :  { %1746 = vmatprep.subr.bf16.mxu0 %v2823_v43 }
 0x181   :  { %1747 = vmatpush3.bf16.msra.mxu0 %v2824_v45 }
 0x182   :  { %1748 = vmatprep.subr.bf16.mxu0 %v2825_v48 }
 0x185   :  { %1749 = vmatpush3.bf16.msra.mxu0 %v2453_v47 }
 0x186   :  { %1750 = vmatprep.subr.bf16.mxu0 %v2459_v50 }
 0x189   :  { %1751 = vmatpush3.bf16.msra.mxu0 %v2465_v38 }
 0x18a   :  { %1767 = vmatprep.subr.bf16.mxu0 %v2276_v0  ;;  %v2826_v0 = vld [vmem:[#allocation20_spill] sm:$0xff] }
 0x18c   :  { %1148 = vmatmul.mubr.bf16.vlgmr.msra.gmra.mxu0 %v993_v52  ;;  %v2843_v52 = vld [vmem:[#allocation47_spill] sm:$0xff] }
 0x18d   :  { %1768 = vmatpush3.bf16.msra.mxu0 %v2281_v2  ;;  %v2827_v2 = vld [vmem:[#allocation21_spill] sm:$0xff] }
 0x18e   :  { %1769 = vmatprep.subr.bf16.mxu0 %v2287_v4  ;;  %v2828_v4 = vld [vmem:[#allocation22_spill] sm:$0xff] }
 0x191   :  { %1770 = vmatpush3.bf16.msra.mxu0 %v2293_v6  ;;  %v2829_v6 = vld [vmem:[#allocation23_spill] sm:$0xff] }
 0x192   :  { %1771 = vmatprep.subr.bf16.mxu0 %v2299_v8  ;;  %v1730_v8 = vpop.f32.mrf.mxu1 }
 0x195   :  { %1772 = vmatpush3.bf16.msra.mxu0 %v2305_v10  ;;  %v1731_v10 = vpop.f32.mrf.mxu1 }
 0x196   :  { %1773 = vmatprep.subr.bf16.mxu0 %v2311_v12  ;;  %v2630_v12 = vadd.f32 %v1731_v10, %v1730_v8  ;;  %v2847_v10 = vld [vmem:[#allocation51_spill] sm:$0xff] }
 0x199   :  { %1774 = vmatpush3.bf16.msra.mxu0 %v2317_v14  ;;  %v1733_v14 = vpop.f32.mrf.mxu1 }
 0x19a   :  { %1775 = vmatprep.subr.bf16.mxu0 %v2323_v16  ;;  %v2848_v14 = vld [vmem:[#allocation52_spill] sm:$0xff] }
 0x19b   :  { %v1734_v16 = vpop.f32.mrf.mxu1 }
 0x19d   :  { %1776 = vmatpush3.bf16.msra.mxu0 %v2329_v18  ;;  %v2632_v18 = vld [vmem:[#allocation7] sm:$0xff] }
 0x19e   :  { %1777 = vmatprep.subr.bf16.mxu0 %v2335_v20  ;;  %v1209_v20 = vrot.slane %v2632_v18, %v2364_v35 }
 0x1a0   :  { %v1244_v1 = vpack.c.bf16 %v1209_v20, %v1209_v20 }
 0x1a1   :  { %1778 = vmatpush3.bf16.msra.mxu0 %v2341_v25  ;;  %v1217_v25 = vcombine.high %v1209_v20, %v1209_v20  ;;  %v1030_v20 = vadd.f32 %v2616_v31, %v2571_v23 }
 0x1a2   :  { %1779 = vmatprep.subr.bf16.mxu0 %v2347_v27 }
 0x1a3   :  { %v1245_v27 = vpack.c.bf16 %v1217_v25, %v1217_v25 }
 0x1a5   :  { %1780 = vmatpush3.bf16.msra.mxu0 %v2826_v0  ;;  %1284 = vmatprep.mubr.bf16.mxu0 %v1245_v27 }
 0x1a6   :  { %1781 = vmatprep.subr.bf16.mxu0 %v2827_v2 }
 0x1a9   :  { %1782 = vmatpush3.bf16.msra.mxu0 %v2828_v4  ;;  %v2846_v4 = vld [vmem:[#allocation50_spill] sm:$0xff] }
 0x1aa   :  { %1811 = vmatprep.subr.bf16.mxu0 %v2829_v6 }
 0x1ac   :  { %1285 = vmatmul.mubr.bf16.vlgmr.msra.gmra.mxu0 %v1244_v1 }
 0x1ad   :  { %1812 = vmatpush3.bf16.msra.mxu0 %v2382_v46  ;;  %v2836_v46 = vld [vmem:[#allocation40_spill] sm:$0xff] }
 0x1ae   :  { %1813 = vmatprep.subr.bf16.mxu0 %v2386_v51  ;;  %v2648_v51 = vld [vmem:[#allocation7 + $0x8] sm:$0xff] }
 0x1b1   :  { %1814 = vmatpush3.bf16.msra.mxu0 %v2390_v54  ;;  %v1226_v54 = vrot.slane %v2648_v51, %v2364_v35 }
 0x1b2   :  { %1815 = vmatprep.subr.bf16.mxu0 %v2396_v56  ;;  %v2837_v56 = vld [vmem:[#allocation42_spill] sm:$0xff] }
 0x1b3   :  { %v1234_v44 = vcombine.high %v1226_v54, %v1226_v54  ;;  %v1248_v5 = vpack.c.bf16 %v1226_v54, %v1226_v54 }
 0x1b5   :  { %1816 = vmatpush3.bf16.msra.mxu0 %v2402_v58  ;;  %v2838_v58 = vld [vmem:[#allocation43_spill] sm:$0xff]  ;;  %v1249_v53 = vpack.c.bf16 %v1234_v44, %v1234_v44 }
 0x1b6   :  { %1817 = vmatprep.subr.bf16.mxu0 %v2830_v61 }
 0x1b7   :  { %1364 = vmatprep.mubr.bf16.mxu0 %v1249_v53 }
 0x1b9   :  { %1818 = vmatpush3.bf16.msra.mxu0 %v2831_v63 }
 0x1ba   :  { %1819 = vmatprep.subr.bf16.mxu0 %v2832_v59 }
 0x1bd   :  { %1820 = vmatpush3.bf16.msra.mxu0 %v2833_v57  ;;  %v1202_v57 = vcombine.high %v2632_v18, %v2632_v18  ;;  %v2018_v18 = vld [vmem:[#allocation8 + $0xe8] sm:$0xff]  }
 0x1be   :  { %1821 = vmatprep.subr.bf16.mxu0 %v2834_v55 }
 0x1c1   :  { %1822 = vmatpush3.bf16.msra.mxu0 %v2835_v36  ;;  %v1216_v36 = vrot.slane %v1202_v57, %v2364_v35 }
 0x1c2   :  { %1823 = vmatprep.subr.bf16.mxu0 %v2836_v46 }
 0x1c5   :  { %1824 = vmatpush3.bf16.msra.mxu0 %v2837_v56 }
 0x1c6   :  { %1825 = vmatprep.subr.bf16.mxu0 %v2838_v58  ;;  %v1218_v58 = vcombine.high %v1216_v36, %v1216_v36 }
 0x1c9   :  { %1826 = vmatpush3.bf16.msra.mxu0 %v2839_v3  ;;  %v1247_v3 = vpack.c.bf16 %v1218_v58, %v1218_v58 }
 0x1ca   :  { %1904 = vmatprep.subr.bf16.mxu0 %v2840_v7 }
 0x1cc   :  { %1365 = vmatmul.mubr.bf16.vlgmr.msra.gmra.mxu0 %v1248_v5 }
 0x1cd   :  { %1905 = vmatpush3.bf16.msra.mxu0 %v2841_v9  ;;  %1920 = vmatprep.mubr.msk.bf16.mxu0 %vm2201_vm0, %v2840_v7  ;;  %v2017_v9 = vld [vmem:[#allocation8 + $0xb0] sm:$0xff]  }
 0x1ce   :  { %1906 = vmatprep.subr.bf16.mxu0 %v2840_v7 }
 0x1d1   :  { %1907 = vmatpush3.bf16.msra.mxu0 %v2842_v11  ;;  %v2019_v11 = vld [vmem:[#allocation8 + $0xa8] sm:$0xff]  }
 0x1d2   :  { %1908 = vmatprep.subr.bf16.mxu0 %v2840_v7 }
 0x1d5   :  { %1909 = vmatpush3.bf16.msra.mxu0 %v2843_v52  ;;  %v2020_v52 = vld [vmem:[#allocation8 + $0xe0] sm:$0xff]  }
 0x1d6   :  { %1910 = vmatprep.subr.bf16.mxu0 %v2840_v7 }
 0x1d9   :  { %1911 = vmatpush3.bf16.msra.mxu0 %v2844_v29  ;;  %v2021_v29 = vld [vmem:[#allocation8 + $0xa0] sm:$0xff]  }
 0x1da   :  { %1912 = vmatprep.subr.bf16.mxu0 %v2840_v7 }
 0x1dd   :  { %1913 = vmatpush3.bf16.msra.mxu0 %v2845_v33  ;;  %v1219_v33 = vcombine.high %v2648_v51, %v2648_v51 }
 0x1de   :  { %1914 = vmatprep.subr.bf16.mxu0 %v2840_v7 }
 0x1e1   :  { %1915 = vmatpush3.bf16.msra.mxu0 %v2846_v4 }
 0x1e2   :  { %1916 = vmatprep.subr.bf16.mxu0 %v2840_v7 }
 0x1e5   :  { %1917 = vmatpush3.bf16.msra.mxu0 %v2847_v10 }
 0x1e6   :  { %1918 = vmatprep.subr.bf16.mxu0 %v2840_v7  ;;  %v2015_v7 = vld [vmem:[#allocation8 + $0xb8] sm:$0xff]  }
 0x1e9   :  { %1919 = vmatpush3.bf16.msra.mxu0 %v2848_v14 }
 0x20c   :  { %v934_v41 = vpop.f32.mrf.mxu0 }
 0x20d   :  { %v935_v0 = vadd.f32 %v2669_v40, %v934_v41  ;;  %v1233_v41 = vrot.slane %v1219_v33, %v2364_v35 }
 0x20e   :  { %v1882_v2 = vpop.f32.mrf.mxu0 }
 0x20f   :  { %940 = vst [vmem:[#allocation11] sm:$0x3] %v935_v0  ;;  %v1235_v0 = vcombine.high %v1233_v41, %v1233_v41  ;;  %v1246_v2 = vpack.c.bf16 %v1216_v36, %v1216_v36 }
 0x210   :  { %v937_v6 = vpop.f32.mrf.mxu0 }
 0x212   :  { %v1883_v8 = vpop.f32.mrf.mxu0 }
 0x22c   :  { %v1708_v16 = vpop.f32.mrf.mxu0 }
 0x22e   :  { %v1709_v25 = vpop.f32.mrf.mxu0 }
 0x22f   :  { %v1710_v27 = vadd.f32 %v1709_v25, %v1708_v16 }
 0x230   :  { %v1711_v1 = vpop.f32.mrf.mxu0 }
 0x231   :  { %v1070_v61 = vadd.f32 %v1710_v27, %v1030_v20 }
 0x232   :  { %v1712_v63 = vpop.f32.mrf.mxu0 }
 0x233   :  { %v1110_v59 = vadd.f32 %v2630_v12, %v1070_v61  ;;  %v2016_v12 = vld [vmem:[#allocation8 + $0xf0] sm:$0xff]  }
 0x24c   :  { %v1752_v55 = vpop.f32.mrf.mxu0 }
 0x24e   :  { %v1753_v46 = vpop.f32.mrf.mxu0 }
 0x24f   :  { %v1754_v54 = vadd.f32 %v1753_v46, %v1752_v55 }
 0x250   :  { %v1755_v56 = vpop.f32.mrf.mxu0 }
 0x251   :  { %v1150_v44 = vadd.f32 %v1754_v54, %v1110_v59 }
 0x252   :  { %v1756_v53 = vpop.f32.mrf.mxu0 }
 0x253   :  { %v1155_v31 = vmax.f32 %v1150_v44, 0.0 }
 0x255   :  { %v1156_v5 = vpack.c.bf16 %v1155_v31, %v1155_v31 }
 0x257   :  { %1901 = vmatmul.mubr.bf16.vlgmr.msra.gmra.mxu1 %v1156_v5 }
 0x258   :  { %1790 = vmatpush3.bf16.msra.mxu1 %v2015_v7  ;;  %1324 = vmatprep.mubr.bf16.mxu1 %v1247_v3 }
 0x259   :  { %1791 = vmatprep.subr.bf16.mxu1 %v2016_v12 }
 0x25c   :  { %1792 = vmatpush3.bf16.msra.mxu1 %v2017_v9 }
 0x25d   :  { %1793 = vmatprep.subr.bf16.mxu1 %v2018_v18 }
 0x260   :  { %1794 = vmatpush3.bf16.msra.mxu1 %v2019_v11 }
 0x261   :  { %1795 = vmatprep.subr.bf16.mxu1 %v2020_v52 }
 0x264   :  { %1796 = vmatpush3.bf16.msra.mxu1 %v2021_v29 }
 0x265   :  { %1797 = vmatprep.subr.bf16.mxu1 %v2326_v17  ;;  %v1251_v17 = vpack.c.bf16 %v1235_v0, %v1235_v0 }
 0x268   :  { %1798 = vmatpush3.bf16.msra.mxu1 %v2332_v19  ;;  %v1250_v19 = vpack.c.bf16 %v1233_v41, %v1233_v41 }
 0x269   :  { %1799 = vmatprep.subr.bf16.mxu1 %v2338_v21 }
 0x26c   :  { %1800 = vmatpush3.bf16.msra.mxu1 %v2344_v26  ;;  %v1783_v21 = vpop.f32.mrf.mxu0 }
 0x26d   :  { %1801 = vmatprep.subr.bf16.mxu1 %v2350_v28 }
 0x26e   :  { %v1784_v26 = vpop.f32.mrf.mxu0 }
 0x26f   :  { %v1785_v28 = vadd.f32 %v1784_v26, %v1783_v21 }
 0x270   :  { %1802 = vmatpush3.bf16.msra.mxu1 %v2356_v32  ;;  %v1786_v32 = vpop.f32.mrf.mxu0 }
 0x271   :  { %1803 = vmatprep.subr.bf16.mxu1 %v2362_v34 }
 0x272   :  { %v1787_v34 = vpop.f32.mrf.mxu0 }
 0x274   :  { %1804 = vmatpush3.bf16.msra.mxu1 %v2370_v37 }
 0x275   :  { %1833 = vmatprep.subr.bf16.mxu1 %v2377_v42 }
 0x277   :  { %1325 = vmatmul.mubr.bf16.vlgmr.msra.gmra.mxu1 %v1246_v2 }
 0x278   :  { %1834 = vmatpush3.bf16.msra.mxu1 %v2384_v49  ;;  %1404 = vmatprep.mubr.bf16.mxu1 %v1251_v17 }
 0x279   :  { %1835 = vmatprep.subr.bf16.mxu1 %v2815_v13 }
 0x27c   :  { %1836 = vmatpush3.bf16.msra.mxu1 %v2816_v15 }
 0x27d   :  { %1837 = vmatprep.subr.bf16.mxu1 %v2817_v60 }
 0x280   :  { %1838 = vmatpush3.bf16.msra.mxu1 %v2818_v62 }
 0x281   :  { %1839 = vmatprep.subr.bf16.mxu1 %v2819_v22 }
 0x284   :  { %1840 = vmatpush3.bf16.msra.mxu1 %v2820_v24 }
 0x285   :  { %1841 = vmatprep.subr.bf16.mxu1 %v2821_v30 }
 0x288   :  { %1842 = vmatpush3.bf16.msra.mxu1 %v2822_v39 }
 0x289   :  { %1843 = vmatprep.subr.bf16.mxu1 %v2823_v43 }
 0x28c   :  { %1844 = vmatpush3.bf16.msra.mxu1 %v2824_v45  ;;  %v1827_v35 = vpop.f32.mrf.mxu0 }
 0x28d   :  { %1845 = vmatprep.subr.bf16.mxu1 %v2825_v48 }
 0x28e   :  { %v1828_v37 = vpop.f32.mrf.mxu0 }
 0x28f   :  { %v1829_v42 = vadd.f32 %v1828_v37, %v1827_v35 }
 0x290   :  { %1846 = vmatpush3.bf16.msra.mxu1 %v2453_v47  ;;  %v1830_v49 = vpop.f32.mrf.mxu0 }
 0x291   :  { %1847 = vmatprep.subr.bf16.mxu1 %v2459_v50 }
 0x292   :  { %v1831_v13 = vpop.f32.mrf.mxu0 }
 0x294   :  { %1848 = vmatpush3.bf16.msra.mxu1 %v2465_v38  ;;  %v1287_v38 = vadd.f32 %v1785_v28, %v2571_v23 }
 0x297   :  { %1405 = vmatmul.mubr.bf16.vlgmr.msra.gmra.mxu1 %v1250_v19 }
 0x317   :  { %v1191_v15 = vpop.f32.mrf.mxu1 }
 0x318   :  { %v1192_v60 = vadd.f32 %v2669_v40, %v1191_v15 }
 0x319   :  { %v1902_v47 = vpop.f32.mrf.mxu1 }
 0x31a   :  { %1197 = vst [vmem:[#allocation12] sm:$0x3] %v1192_v60 }
 0x31b   :  { %v1194_v50 = vpop.f32.mrf.mxu1 }
 0x31d   :  { %v1903_v62 = vpop.f32.mrf.mxu1 }
 0x337   :  { %v1805_v22 = vpop.f32.mrf.mxu1 }
 0x339   :  { %v1806_v24 = vpop.f32.mrf.mxu1 }
 0x33a   :  { %v1807_v30 = vadd.f32 %v1806_v24, %v1805_v22 }
 0x33b   :  { %v1808_v39 = vpop.f32.mrf.mxu1 }
 0x33c   :  { %v1327_v43 = vadd.f32 %v1807_v30, %v1287_v38 }
 0x33d   :  { %v1809_v45 = vpop.f32.mrf.mxu1 }
 0x33e   :  { %v1367_v48 = vadd.f32 %v1829_v42, %v1327_v43 }
 0x357   :  { %v1849_v51 = vpop.f32.mrf.mxu1 }
 0x359   :  { %v1850_v4 = vpop.f32.mrf.mxu1 }
 0x35a   :  { %v1851_v6 = vadd.f32 %v1850_v4, %v1849_v51 }
 0x35b   :  { %v1852_v8 = vpop.f32.mrf.mxu1 }
 0x35c   :  { %v1407_v10 = vadd.f32 %v1851_v6, %v1367_v48 }
 0x35d   :  { %v1853_v14 = vpop.f32.mrf.mxu1 }
 0x35e   :  { %v1412_v16 = vmax.f32 %v1407_v10, 0.0 }
 0x360   :  { %v1413_v20 = vpack.c.bf16 %v1412_v16, %v1412_v16 }
 0x362   :  { %1921 = vmatmul.mubr.bf16.vlgmr.msra.gmra.mxu0 %v1413_v20 }
 0x363   :  { %2133 = shalt.err (!%p2130_p1)
}
 0x364   :  { %1474 = dma.vmem_to_hbm [thread:$0]  %s1472_s13, 32, %s2732_s8, [#allocation13]  }
 0x365   :  { %s2142_s19 = scalar_lea.vmem %s1462_s15, 32  ;;  %p2147_p3 = scmp.lt.s32.totalorder %s1462_s15, %s1462_s15 }
 0x366   :  { %p2143_p2 = scmp.ne.s32.totalorder %s1462_s15, %s2142_s19  ;;  %p2148_p4 = scmp.lt.s32.totalorder %s2142_s19, %s2142_s19 }
 0x368   :  { %p2149_p5 = por %p2148_p4, %p2147_p3 }
 0x36a   :  { %p2150_p6 = pnand %p2149_p5, %p2143_p2 }
 0x36c   :  { %2153 = shalt.err (!%p2150_p6)
}
 0x36d   :  { %1464 = dma.vmem_to_hbm [thread:$0]  %s1462_s15, 32, %s2731_s7, [#allocation4]  }
 0x36e   :  { %s2204_s22 = smov [#allocation14]  }
 0x36f   :  { %s1481_s23 = sshll.u32 %s2204_s22, 4  ;;  %s1482_s23 = int_to_ptr.vmem [resolvable:$true] %s1481_s23 }
 0x370   :  { %s2162_s8 = scalar_lea.vmem %s1482_s23, 32  ;;  %p2167_p8 = scmp.lt.s32.totalorder %s1482_s23, %s1482_s23 }
 0x371   :  { %p2163_p7 = scmp.ne.s32.totalorder %s1482_s23, %s2162_s8  ;;  %p2168_p9 = scmp.lt.s32.totalorder %s2162_s8, %s2162_s8 }
 0x373   :  { %p2169_p10 = por %p2168_p9, %p2167_p8 }
 0x375   :  { %p2170_p11 = pnand %p2169_p10, %p2163_p7 }
 0x422   :  { %v1448_v23 = vpop.f32.mrf.mxu0 }
 0x423   :  { %v1449_v25 = vadd.f32 %v2669_v40, %v1448_v23 }
 0x424   :  { %v1922_v27 = vpop.f32.mrf.mxu0 }
 0x425   :  { %1454 = vst [vmem:[#allocation14] sm:$0x3] %v1449_v25 }
 0x426   :  { %v1451_v1 = vpop.f32.mrf.mxu0 }
 0x427   :  { %2173 = shalt.err (!%p2170_p11)
}
 0x428   :  { %1484 = dma.vmem_to_hbm [thread:$0]  %s1482_s23, 32, %s2733_s9, [#allocation13]   ;;  %v1923_v61 = vpop.f32.mrf.mxu0 }
 0x429   :  { %2188 = dma.done.wait [#allocation4], 32  }
 0x42a   :  { %2189 = vsyncadd [#allocation4], 4294967264 }
 0x42b   :  { %2190 = dma.done.wait [#allocation13], 64  }
 0x42c   :  { %2191 = vsyncadd [#allocation13], 4294967232 }
 0x42d   :  { %1494 = vsyncpa [#allocation3], 1 }
 0x42e   :  { %1495 = vsyncpa [#allocation6], 1 }
 0x42f   :  { %1496 = vsyncpa [#allocation9], 1 }
 0x430   :  { %1497 = vsyncpa [#allocation4], 1 }
 0x431   :  { %1498 = vsyncpa [#allocation13], 1 }

</bundles_post_ra>
